<compile_context>
chip_gen: v6e
topology: v6e:2x2x1
jax: 0.10.0
libtpu: 0.0.40
codegen_flags: <defaults>
</compile_context>

<pallas_src>
import math

import jax
import jax.numpy as jnp
from jax.experimental import pallas as pl
from jax.experimental.pallas import tpu as pltpu

FILTER_NUM = 2   # NodeBernNet default
K = 3            # Bernstein basis degree
LANE = 128       # TPU lane width (lane-dense output padding)


def _round_up(a, b):
    return (a + b - 1) // b * b


def _lcm(a, b):
    return a * b // math.gcd(a, b)


# Bernstein(K=3) basis expressed in the propagation ("monomial") basis
# {Tx0, Tx1, Tx2, Tx3}:   B_j = sum_k M[j,k] * Tx_k.
# Folding theta through this matrix (c = theta @ M) lets each filter
# polynomial be built directly from {h, Tx1, Tx2, Tx3} with 4 scalars.
_BERN_TO_MONO = jnp.array([[1.0, -3.0, 3.0, -1.0],
                           [0.0, 3.0, -6.0, 3.0],
                           [0.0, 0.0, 3.0, -3.0],
                           [0.0, 0.0, 0.0, 1.0]], dtype=jnp.float32)


# ---------------------------------------------------------------------------
# Kernel 1: h = relu(x @ Win + bin), row-tiled over nodes.
# ---------------------------------------------------------------------------
def _linear_in_kernel(x_ref, Win_ref, bin_ref, h_ref):
    h = jnp.dot(x_ref[...], Win_ref[...], preferred_element_type=jnp.float32)
    h_ref[...] = jnp.maximum(h + bin_ref[...], 0.0)


def linear_in(x, Win, bin_, *, tile_m):
    Np, Cin = x.shape
    C = Win.shape[1]
    return pl.pallas_call(
        _linear_in_kernel,
        out_shape=jax.ShapeDtypeStruct((Np, C), jnp.float32),
        grid_spec=pltpu.PrefetchScalarGridSpec(
            num_scalar_prefetch=0,
            grid=(Np // tile_m,),
            in_specs=[
                pl.BlockSpec((tile_m, Cin), lambda i: (i, 0)),   # moves with rows
                pl.BlockSpec((Cin, C), lambda i: (0, 0)),        # VMEM-resident
                pl.BlockSpec((1, C), lambda i: (0, 0)),          # VMEM-resident
            ],
            out_specs=pl.BlockSpec((tile_m, C), lambda i: (i, 0)),
        ),
        compiler_params=pltpu.CompilerParams(
            dimension_semantics=("parallel",)),
    )(x, Win, bin_)


# ---------------------------------------------------------------------------
# Kernel 2: Y = L @ X  (one propagation hop).
#   * L (bf16) streams as (tile_m, tile_k) blocks; reduction axis last.
#   * X (bf16) is VMEM-resident: full-array block (n_k, tile_k, C) with a
#     constant index_map; the kernel picks the k-th chunk with x_ref[k].
#   * f32 accumulator scratch; output written once on the last k step.
# ---------------------------------------------------------------------------
def _propagate_kernel(L_ref, x_ref, o_ref, acc_ref):
    k = pl.program_id(1)

    @pl.when(k == 0)
    def _():
        acc_ref[...] = jnp.zeros_like(acc_ref)

    acc_ref[...] += jnp.dot(L_ref[...], x_ref[k],
                            preferred_element_type=jnp.float32)

    @pl.when(k == pl.num_programs(1) - 1)
    def _():
        o_ref[...] = acc_ref[...]


def propagate(L_bf16, x_bf16, *, tile_m, tile_k):
    Np = L_bf16.shape[0]
    C = x_bf16.shape[1]
    n_k = Np // tile_k
    x3 = x_bf16.reshape(n_k, tile_k, C)   # row-major split: chunk k = rows [k*tile_k, ...)

    # explicit VMEM budget: L double-buffer + resident X (count 2 slots) +
    # output double-buffer + accumulator, plus headroom; capped below v7x's
    # 64 MiB physical VMEM.
    need = (2 * tile_m * tile_k * 2
            + 2 * Np * C * 2
            + 2 * tile_m * C * 4
            + tile_m * C * 4)
    vmem_limit = min(int(need) + (16 << 20), 56 << 20)

    return pl.pallas_call(
        _propagate_kernel,
        out_shape=jax.ShapeDtypeStruct((Np, C), jnp.float32),
        grid_spec=pltpu.PrefetchScalarGridSpec(
            num_scalar_prefetch=0,
            grid=(Np // tile_m, n_k),
            in_specs=[
                pl.BlockSpec((tile_m, tile_k), lambda i, k: (i, k)),   # L streams
                pl.BlockSpec((n_k, tile_k, C), lambda i, k: (0, 0, 0)),  # X resident
            ],
            out_specs=pl.BlockSpec((tile_m, C), lambda i, k: (i, 0)),
            scratch_shapes=[pltpu.VMEM((tile_m, C), jnp.float32)],
        ),
        compiler_params=pltpu.CompilerParams(
            dimension_semantics=("parallel", "arbitrary"),
            vmem_limit_bytes=vmem_limit),
    )(L_bf16, x3)


# ---------------------------------------------------------------------------
# Kernel 3: per-row attention + filter mixing + classifier (fused), row-tiled.
#   Input is the packed lane-dense slab T = (h | Tx1 | Tx2 | Tx3)  [tm, 4C].
# ---------------------------------------------------------------------------
def _attn_cls_kernel(c_ref,                                   # SMEM (2, K+1)
                     T_ref,                                   # [tm, 4C]
                     Mattn_ref, battn_ref, vc2_ref,           # fused attn weights
                     W1_ref, b1_ref, W2_ref, b2_ref, W3_ref, b3_ref,
                     out_ref):                                # [tm, 128]
    f32 = jnp.float32
    T = T_ref[...]
    C = T.shape[1] // 4
    h = T[:, 0 * C:1 * C]
    t1 = T[:, 1 * C:2 * C]
    t2 = T[:, 2 * C:3 * C]
    t3 = T[:, 3 * C:4 * C]

    # theta folded into the monomial basis -> exact f32 VPU combos, no B0..B3.
    p0 = c_ref[0, 0] * h + c_ref[0, 1] * t1 + c_ref[0, 2] * t2 + c_ref[0, 3] * t3
    p1 = c_ref[1, 0] * h + c_ref[1, 1] * t1 + c_ref[1, 2] * t2 + c_ref[1, 3] * t3

    # Fused attention projection for both filters: one [tm,4C] @ [4C,2C]
    # matmul (Wb folded per basis block, Wx folded into the h block,
    # bb + bx folded into battn).
    A = jnp.tanh(jnp.dot(T, Mattn_ref[...], preferred_element_type=f32)
                 + battn_ref[...])                            # [tm, 2C]

    # 'Concat' attention score: elementwise * vc row, then lane reduction.
    s = A * vc2_ref[...]
    s0 = jnp.sum(s[:, :C], axis=-1, keepdims=True)            # [tm, 1]
    s1 = jnp.sum(s[:, C:], axis=-1, keepdims=True)

    # softmax over the FILTER_NUM=2 filters, then mix the polynomials.
    m = jnp.maximum(s0, s1)
    e0 = jnp.exp(s0 - m)
    e1 = jnp.exp(s1 - m)
    inv = pl.reciprocal(e0 + e1, approx=True)                 # EUP slot
    res = (e0 * p0 + e1 * p1) * inv

    # classifier: Linear -> ReLU -> Linear -> ReLU -> Linear (lane-padded out)
    y = jnp.maximum(jnp.dot(res, W1_ref[...], preferred_element_type=f32)
                    + b1_ref[...], 0.0)
    y = jnp.maximum(jnp.dot(y, W2_ref[...], preferred_element_type=f32)
                    + b2_ref[...], 0.0)
    out_ref[...] = (jnp.dot(y, W3_ref[...], preferred_element_type=f32)
                    + b3_ref[...])


def attn_cls(coeffs, T, Mattn, battn, vc2, W1, b1, W2, b2, W3p, b3p, *, tile_m):
    Np, C4 = T.shape
    out_w = W3p.shape[1]

    def rowspec(shape):
        # index_map also receives the scalar-prefetch ref -> accept *_
        return pl.BlockSpec(shape, lambda i, *_: (i, 0))

    def resident(shape):
        return pl.BlockSpec(shape, lambda i, *_: (0, 0))

    return pl.pallas_call(
        _attn_cls_kernel,
        out_shape=jax.ShapeDtypeStruct((Np, out_w), jnp.float32),
        grid_spec=pltpu.PrefetchScalarGridSpec(
            num_scalar_prefetch=1,                            # coeffs -> SMEM
            grid=(Np // tile_m,),
            in_specs=[
                rowspec((tile_m, C4)),                        # packed T
                resident(Mattn.shape), resident(battn.shape), resident(vc2.shape),
                resident(W1.shape), resident(b1.shape),
                resident(W2.shape), resident(b2.shape),
                resident(W3p.shape), resident(b3p.shape),
            ],
            out_specs=rowspec((tile_m, out_w)),
        ),
        compiler_params=pltpu.CompilerParams(
            dimension_semantics=("parallel",)),
    )(coeffs, T, Mattn, battn, vc2, W1, b1, W2, b2, W3p, b3p)


# ---------------------------------------------------------------------------
# Tiling plan + operator preprocessing (hoistable: L is static across steps).
# ---------------------------------------------------------------------------
def plan_tiles(N, *, tile_prop=512, tile_attn=128):
    cap = _round_up(N, 16)
    tile_prop = max(16, min(_round_up(tile_prop, 16), cap))   # bf16-sublane friendly
    tile_attn = max(8, min(_round_up(tile_attn, 8), cap))
    base = _lcm(tile_prop, tile_attn)
    Np = _round_up(N, base)
    # v7x megacore: prefer an even number of propagate row tiles (best effort).
    nt = Np // tile_prop
    if nt > 1 and nt % 2 == 1 and (base // tile_prop) % 2 == 1:
        Np += base
    # reduction tile for L @ X: largest of {2048,1024,512,256} dividing Np,
    # else the full extent (never 128 — v7x MXU occupancy).
    tile_k = Np
    for cand in (2048, 1024, 512, 256):
        if Np >= cand and Np % cand == 0:
            tile_k = cand
            break
    return {"Np": Np, "tile_prop": tile_prop,
            "tile_attn": tile_attn, "tile_k": tile_k}


def prepare_operator(L, Np):
    """Cast-then-pad the dense operator once (hoist outside the step loop)."""
    N = L.shape[0]
    return jnp.pad(L.astype(jnp.bfloat16), ((0, Np - N), (0, Np - N)))


# ---------------------------------------------------------------------------
# Full forward.
# ---------------------------------------------------------------------------
def node_bernnet_forward(x, L_bf16, params, plan):
    N = x.shape[0]
    Np = plan["Np"]
    tile_prop, tile_attn, tile_k = plan["tile_prop"], plan["tile_attn"], plan["tile_k"]
    C = params["Win"].shape[1]
    num_class = params["W3"].shape[1]
    assert num_class <= LANE
    assert L_bf16.shape == (Np, Np)

    # zero-pad the node dimension (zero rows/cols of L leave real rows exact)
    x_p = jnp.pad(x, ((0, Np - N), (0, 0)))

    # --- small per-call precomputes (O(C^2), negligible next to the L stream)
    coeffs = params["theta"] @ _BERN_TO_MONO                  # (FILTER_NUM, K+1)
    Wb, Wx = params["Wb"], params["Wx"]
    cols = []
    for j in range(FILTER_NUM):
        blk = [coeffs[j, 0] * Wb + Wx] + [coeffs[j, k] * Wb for k in range(1, K + 1)]
        cols.append(jnp.concatenate(blk, axis=0))             # (4C, C)
    Mattn = jnp.concatenate(cols, axis=1)                     # (4C, 2C)
    battn = jnp.tile(params["bb"] + params["bx"], (1, FILTER_NUM))   # (1, 2C)
    vc2 = jnp.tile(params["vc"].reshape(1, C), (1, FILTER_NUM))      # (1, 2C)

    # lane-dense classifier output: pad num_class -> 128 lanes with zeros
    W3p = jnp.pad(params["W3"], ((0, 0), (0, LANE - num_class)))
    b3p = jnp.pad(params["b3"], ((0, 0), (0, LANE - num_class)))

    bf16 = jnp.bfloat16
    h = linear_in(x_p, params["Win"], params["bin"], tile_m=tile_prop)
    tx1 = propagate(L_bf16, h.astype(bf16), tile_m=tile_prop, tile_k=tile_k)
    tx2 = propagate(L_bf16, tx1.astype(bf16), tile_m=tile_prop, tile_k=tile_k)
    tx3 = propagate(L_bf16, tx2.astype(bf16), tile_m=tile_prop, tile_k=tile_k)

    # pack into one lane-dense (Np, 4C) slab (4C == 128 lanes at C=32)
    T = jnp.concatenate([h, tx1, tx2, tx3], axis=1)

    out_pad = attn_cls(coeffs, T, Mattn, battn, vc2,
                       params["W1"], params["b1"], params["W2"], params["b2"],
                       W3p, b3p, tile_m=tile_attn)
    return out_pad[:N, :num_class]


# ---------------------------------------------------------------------------
# Pure-JAX reference (mirrors the torch forward in eval mode).
# ---------------------------------------------------------------------------
def node_bernnet_reference(x, L, p, match_kernel_precision=False):
    f32 = jnp.float32
    h = jnp.maximum(x @ p["Win"] + p["bin"][0], 0.0)
    if match_kernel_precision:
        Lm = L.astype(jnp.bfloat16).astype(f32)
        prop = lambda v: Lm @ v.astype(jnp.bfloat16).astype(f32)
    else:
        prop = lambda v: L @ v
    Tx1 = prop(h)
    Tx2 = prop(Tx1)
    Tx3 = prop(Tx2)
    B0 = h - 3.0 * Tx1 + 3.0 * Tx2 - Tx3
    B1 = 3.0 * Tx1 - 6.0 * Tx2 + 3.0 * Tx3
    B2 = 3.0 * Tx2 - 3.0 * Tx3
    B3 = Tx3
    th = p["theta"]
    polys = [th[i, 0] * B0 + th[i, 1] * B1 + th[i, 2] * B2 + th[i, 3] * B3
             for i in range(FILTER_NUM)]
    x_proj = h @ p["Wx"] + p["bx"][0]
    scores = [jnp.tanh(pp @ p["Wb"] + p["bb"][0] + x_proj) @ p["vc"]
              for pp in polys]
    s = jnp.concatenate(scores, axis=1)
    w = jax.nn.softmax(s, axis=1)
    res = polys[0] * w[:, 0:1] + polys[1] * w[:, 1:2]
    y = jnp.maximum(res @ p["W1"] + p["b1"][0], 0.0)
    y = jnp.maximum(y @ p["W2"] + p["b2"][0], 0.0)
    return y @ p["W3"] + p["b3"][0]


def make_params(key, in_channels, out_channels, num_class):
    ks = jax.random.split(key, 8)
    C = out_channels
    Ch = out_channels // 2

    def lin(k, fan_in, fan_out):
        kw, kb = jax.random.split(k)
        bound = 1.0 / jnp.sqrt(fan_in)
        W = jax.random.uniform(kw, (fan_in, fan_out), jnp.float32, -bound, bound)
        b = jax.random.uniform(kb, (1, fan_out), jnp.float32, -bound, bound)
        return W, b

    Win, bin_ = lin(ks[0], in_channels, C)
    Wb, bb = lin(ks[1], C, C)
    Wx, bx = lin(ks[2], C, C)
    W1, b1 = lin(ks[3], C, C)
    W2, b2 = lin(ks[4], C, Ch)
    W3, b3 = lin(ks[5], Ch, num_class)
    vc = jax.random.normal(ks[6], (C, 1), jnp.float32) * jnp.sqrt(2.0 / C)

    # Module initializes thetas to zeros; use deterministic non-trivial values
    # (they are learnable) so the kernel math is actually exercised.
    theta = jnp.array([[0.5, 1.0, -0.5, 0.25],
                       [-0.25, 0.75, 1.5, -1.0]], dtype=jnp.float32)

    return {"theta": theta, "Win": Win, "bin": bin_, "Wb": Wb, "bb": bb,
            "Wx": Wx, "bx": bx, "vc": vc, "W1": W1, "b1": b1,
            "W2": W2, "b2": b2, "W3": W3, "b3": b3}


if __name__ == "__main__":
    # Small shapes; tiny tiles so this example still exercises row tiling,
    # node-dimension padding (40 -> 64, even propagate-tile count), the
    # resident-RHS reduction pipeline and the packed attention slab.
    # Production defaults are tile_prop=512 / tile_attn=128.
    N, in_channels, out_channels, num_class = 40, 16, 32, 4

    key = jax.random.PRNGKey(0)
    k_x, k_adj, k_p = jax.random.split(key, 3)

    x = jax.random.normal(k_x, (N, in_channels), jnp.float32)

    # deterministic symmetric normalized Laplacian L = I - D^-1/2 A D^-1/2
    a = (jax.random.uniform(k_adj, (N, N)) < 0.3).astype(jnp.float32)
    A = jnp.maximum(a, a.T) * (1.0 - jnp.eye(N, dtype=jnp.float32))
    deg = jnp.maximum(A.sum(axis=1), 1.0)
    d = 1.0 / jnp.sqrt(deg)
    L = jnp.eye(N, dtype=jnp.float32) - d[:, None] * A * d[None, :]

    params = make_params(k_p, in_channels, out_channels, num_class)

    plan = plan_tiles(N, tile_prop=16, tile_attn=16)
    L_bf16 = prepare_operator(L, plan["Np"])   # hoisted: L is static across steps

    y_kernel = node_bernnet_forward(x, L_bf16, params, plan)
    jax.block_until_ready(y_kernel)
    assert y_kernel.shape == (N, num_class)

    # Tight check against a reference that mimics the kernel's bf16 operator
    # precision; loose sanity check against the pure-f32 (torch-semantics) ref
    # (bf16 L over a 3-hop chain gives ~1e-2-level deviations).
    y_ref_match = node_bernnet_reference(x, L, params, match_kernel_precision=True)
    y_ref_f32 = node_bernnet_reference(x, L, params, match_kernel_precision=False)
    assert jnp.allclose(y_kernel, y_ref_match, atol=3e-2, rtol=3e-2), \
        "mismatch vs bf16-matched reference"
    assert jnp.allclose(y_kernel, y_ref_f32, atol=1e-1, rtol=1e-1), \
        "mismatch vs f32 reference"

    print("KERNEL_OK")
</pallas_src>

<mosaic_0001>
module attributes {stable_mosaic.version = 11 : i64} {
  func.func @_linear_in_kernel(%arg0: i32, %arg1: memref<16x16xf32, #tpu.memory_space<vmem>>, %arg2: memref<16x32xf32, #tpu.memory_space<vmem>>, %arg3: memref<1x32xf32, #tpu.memory_space<vmem>>, %arg4: memref<16x32xf32, #tpu.memory_space<vmem>>) attributes {dimension_semantics = [#tpu.dimension_semantics<parallel>], iteration_bounds = array<i64: 4>, scalar_prefetch = 0 : i64, scratch_operands = 0 : i64, tpu.core_type = #tpu.core_type<tc>, window_params = [{transform_indices = @transform_0, window_bounds = array<i64: 16, 16>}, {pipeline_mode = #tpu.pipeline_mode<synchronous>, transform_indices = @transform_1, window_bounds = array<i64: 16, 32>}, {pipeline_mode = #tpu.pipeline_mode<synchronous>, transform_indices = @transform_2, window_bounds = array<i64: 1, 32>}, {transform_indices = @transform_3, window_bounds = array<i64: 16, 32>}]} {
    %c0 = arith.constant 0 : index
    %c0_0 = arith.constant 0 : index
    %0 = vector.load %arg1[%c0, %c0_0] : memref<16x16xf32, #tpu.memory_space<vmem>>, vector<16x16xf32>
    %c0_1 = arith.constant 0 : index
    %c0_2 = arith.constant 0 : index
    %1 = vector.load %arg2[%c0_1, %c0_2] : memref<16x32xf32, #tpu.memory_space<vmem>>, vector<16x32xf32>
    %cst = arith.constant dense<0.000000e+00> : vector<16x32xf32>
    %2 = tpu.matmul %0, %1, %cst {dimension_numbers = #tpu.dot_dimension_numbers<[1], [0], [0], [1], [0, 0, 1, 1], [], []>} : vector<16x16xf32>, vector<16x32xf32>, vector<16x32xf32> -> vector<16x32xf32>
    %c0_3 = arith.constant 0 : index
    %c0_4 = arith.constant 0 : index
    %3 = vector.load %arg3[%c0_3, %c0_4] : memref<1x32xf32, #tpu.memory_space<vmem>>, vector<1x32xf32>
    %4 = vector.broadcast %3 : vector<1x32xf32> to vector<16x32xf32>
    %5 = arith.addf %2, %4 : vector<16x32xf32>
    %cst_5 = arith.constant 0.000000e+00 : f32
    %6 = vector.broadcast %cst_5 : f32 to vector<16x32xf32>
    %7 = arith.maximumf %5, %6 : vector<16x32xf32>
    %c0_6 = arith.constant 0 : index
    %c0_7 = arith.constant 0 : index
    %8 = vector.load %arg4[%c0_6, %c0_7] : memref<16x32xf32, #tpu.memory_space<vmem>>, vector<16x32xf32>
    tpu.vector_store %arg4[%c0_6, %c0_7], %7 {strides = array<i32>} : memref<16x32xf32, #tpu.memory_space<vmem>>, vector<16x32xf32>,
    return
  }
  func.func @transform_0(%arg0: i32) -> (i32, i32) {
    %c0_i32 = arith.constant 0 : i32
    %c0_i32_0 = arith.constant 0 : i32
    return %arg0, %c0_i32 : i32, i32
  }
  func.func @transform_1(%arg0: i32) -> (i32, i32) {
    %c0_i32 = arith.constant 0 : i32
    %c0_i32_0 = arith.constant 0 : i32
    %c0_i32_1 = arith.constant 0 : i32
    return %c0_i32, %c0_i32_0 : i32, i32
  }
  func.func @transform_2(%arg0: i32) -> (i32, i32) {
    %c0_i32 = arith.constant 0 : i32
    %c0_i32_0 = arith.constant 0 : i32
    %c0_i32_1 = arith.constant 0 : i32
    return %c0_i32, %c0_i32_0 : i32, i32
  }
  func.func @transform_3(%arg0: i32) -> (i32, i32) {
    %c0_i32 = arith.constant 0 : i32
    %c0_i32_0 = arith.constant 0 : i32
    return %arg0, %c0_i32 : i32, i32
  }
}

</mosaic_0001>

<bundles_post_ra>
// kernel: tpu_custom_call.1
= control target key start
LH: loop header
LB: loop body
LE: loop exit
PB: predicated region body
PF: predicated region fallthrough
CT: control target
= control target key end

     0   :  { %s389_s12 = smov 0   ;;  %s415_s0 = inlined_call_operand.vmem [shape: f32[64,16], index: 0, kind: input, shape index: {}]   ;;  %s416_s1 = inlined_call_operand.vmem [shape: f32[16,32], index: 1, kind: input, shape index: {}]   ;;  %s417_s2 = inlined_call_operand.vmem [shape: f32[1,32], index: 2, kind: input, shape index: {}]   ;;  %s418_s3 = inlined_call_operand.vmem [shape: f32[64,32], index: 3, kind: output, shape index: {}]  }
   0x1 LB: > { %s328_s13 = sadd.s32 4294967295, %s367_s12   ;;  %p332_p0 = scmp.ge.s32.totalorder %s367_s12, 1  ;;  %s367_s12 = sphi %s389_s12, %s13_s12  }
   0x2   : > { %p138_p1 = scmp.lt.s32.totalorder %s367_s12, 5 }
   0x4   : > { %p139_p2 = pnand %p332_p0, %p138_p1 }
   0x5   : > { %s333_s18 = sshll.u32 (!%p139_p2), %s328_s13, 1 }
   0x6   : > { %142 = sbr.rel (%p139_p2) target bundleno = 216 (0xd8), region = 32  ;;  %p163_p3 = scmp.lt.s32.totalorder (!%p139_p2), %s333_s18, 7 }
   0xb   : > { %v177_v0 = vld [vmem:[%s416_s1 + $0x8] sm:$0xff]  ;;  %v176_v1 = vld [vmem:[%s416_s1] sm:$0xff]  ;;  %s420_s18 = smov (!%p163_p3, %s333_s18), 7  ;;  %vm185_vm0 = vcmask 130048   ;;  %vm269_vm1 = vcmask 261120  }
   0xc   : > { %346 = vmatprep.subr.mxu0 %v177_v0  ;;  %s334_s19 = sshll.u32 %s420_s18, 3  ;;  %v337_v4 = vld [vmem:[%s417_s2] ss:$0 sm:$0xff] }
   0xd   : > { %347 = vmatpush3.msra.mxu0 %v177_v0  ;;  %s166_s22 = scalar_lea.vmem %s415_s0, %s334_s19  ;;  %s172_s27 = scalar_lea.vmem %s418_s3, %s334_s19 }
   0xe   : > { %348 = vmatprep.subr.mxu0 %v176_v1  ;;  %v174_v2 = vld [vmem:[%s166_s22] sm:$0xff]  ;;  %v175_v3 = vld [vmem:[%s166_s22 + $0x8] sm:$0xff] }
   0xf   : > { %349 = vmatpush3.msra.mxu0 %v176_v1  ;;  %350 = vmatprep.mubr.msk.f32.mxu0 %vm185_vm0, %v174_v2 }
  0x10   : > { %351 = vmatmul.mubr.msk.f32.vlgmr.msra.gmra.mxu0 %vm185_vm0, %v175_v3 }
  0xd0   : > { %v352_v5 = vpop.f32.mrf.mxu0 }
  0xd1   : > { %v264_v6 = vadd.f32 %v352_v5, %v337_v4 }
  0xd2   : > { %v258_v7 = vpop.f32.mrf.mxu0 }
  0xd3   : > { %v259_v8 = vadd.f32 %v337_v4, %v258_v7  ;;  %v268_v10 = vmax.f32 %v264_v6, 0.0 }
  0xd5   : > { %v267_v9 = vmax.f32 %v259_v8, 0.0  ;;  %271 = vst.msk [vmem:[%s172_s27 + $0x8] sm:$0xff] %vm269_vm1, %v268_v10 }
  0xd7   : > { %270 = vst.msk [vmem:[%s172_s27] sm:$0xff] %vm269_vm1, %v267_v9 }
  0xd8 PF: > { %s13_s12 = sadd.s32 1, %s367_s12  }
  0xd9   : > { %p10_p4 = scmp.ge.s32.totalorder %s13_s12, 6  }
  0xdb   :  { %12 = sbr.rel (!%p10_p4) target bundleno = 1 (0x1), region = 62 }

</bundles_post_ra>
